<compile_context>
chip_gen: v7x
topology: tpu7x:2x2x1
jax: 0.10.0
libtpu: 0.0.40
codegen_flags: <defaults>
</compile_context>

<pallas_src>
import functools

import jax
import jax.numpy as jnp
from jax.experimental import pallas as pl
from jax.experimental.pallas import tpu as pltpu


_B_RESIDENT_BUDGET = 8 << 20      # max bytes for a fully VMEM-resident B operand
_FUSED_VMEM_BUDGET = 20 << 20     # max estimated bytes for the single-call path


def _round_up(x, m):
    return ((x + m - 1) // m) * m


def _pad2(a, r, c):
    R, C = a.shape
    if (R, C) == (r, c):
        return a
    return jnp.pad(a, ((0, r - R), (0, c - C)))


def _pick_tile(padded_dim):
    """Largest tile in {1024..128} that divides the (128-multiple) padded dim."""
    for t in (1024, 512, 384, 256, 128):
        if padded_dim % t == 0:
            return t
    return 128


def _vmem_limit(request_bytes):
    """Scoped VMEM limit: generous but safely below per-core physical VMEM."""
    cap = 64 << 20                      # conservative fallback (v7x per-core)
    try:
        info = pltpu.get_tpu_info()
        cap = int(getattr(info, "vmem_capacity_bytes", cap)) or cap
    except Exception:
        pass
    ceiling = min((cap * 5) // 8, 96 << 20)   # ~40 MiB on v7x, ~80 MiB on v5e/v6e
    return int(min(max(int(request_bytes), 16 << 20), ceiling))


# ---------------------------------------------------------------------------
# Fused small-graph path: entire forward in one pallas_call (all resident).
# ---------------------------------------------------------------------------
def _fused_fwd_kernel(x_ref, adj_ref, w1_ref, w2_ref, pred_ref, z_ref):
    adjb = adj_ref[...]
    xw1 = jnp.dot(x_ref[...], w1_ref[...], preferred_element_type=jnp.float32)
    h1 = jnp.maximum(
        jnp.dot(adjb, xw1.astype(jnp.bfloat16), preferred_element_type=jnp.float32),
        0.0)
    hw2 = jnp.dot(h1.astype(jnp.bfloat16), w2_ref[...],
                  preferred_element_type=jnp.float32)
    z = jnp.dot(adjb, hw2.astype(jnp.bfloat16), preferred_element_type=jnp.float32)
    z_ref[...] = z
    zb = z.astype(jnp.bfloat16)
    # pred = z @ z.T : contract last axes so z.T is never materialized.
    pred = jax.lax.dot_general(zb, zb,
                               dimension_numbers=(((1,), (1,)), ((), ())),
                               preferred_element_type=jnp.float32)
    pred_ref[...] = pred.astype(pred_ref.dtype)


# ---------------------------------------------------------------------------
# Tiled path, kernel A: narrow-output matmul  out = act(A @ B) [@ W]
#   grid = (M_tiles, K_tiles), K last ("arbitrary"); B (and W) VMEM-resident.
# ---------------------------------------------------------------------------
def _narrow_mm_kernel(*refs, n_k, b_full, tk, activation, has_w, dual_out):
    it = iter(refs)
    a_ref = next(it)
    b_ref = next(it)
    w_ref = next(it) if has_w else None
    o_ref = next(it)
    o2_ref = next(it) if dual_out else None
    acc_ref = next(it) if n_k > 1 else None

    k = pl.program_id(1)
    if b_full and n_k > 1:
        # B is fully resident; slice the K-window in-kernel (fetched from HBM once).
        b_blk = b_ref[pl.ds(pl.multiple_of(k * tk, 128), tk), :]
    else:
        b_blk = b_ref[...]
    part = jnp.dot(a_ref[...], b_blk, preferred_element_type=jnp.float32)

    def _finish(acc):
        if activation == "relu":
            acc = jnp.maximum(acc, 0.0)
        if has_w:
            acc = jnp.dot(acc.astype(w_ref.dtype), w_ref[...],
                          preferred_element_type=jnp.float32)
        o_ref[...] = acc.astype(o_ref.dtype)
        if dual_out:
            o2_ref[...] = acc.astype(o2_ref.dtype)

    if n_k == 1:
        # Single-K fast path: no zero-init, no accumulator read-modify-write.
        _finish(part)
    else:
        @pl.when(k == 0)
        def _():
            acc_ref[...] = jnp.zeros_like(acc_ref)

        acc_ref[...] += part

        @pl.when(k == n_k - 1)
        def _():
            _finish(acc_ref[...])


def _narrow_matmul(a, b, *, w=None, activation=None, dual_out=False,
                   out_dtype=jnp.bfloat16, tm, tk):
    """out = act(a @ b) [@ w]; a:[M,K], b:[K,Nb], w:[Nb,Nw] (all pre-padded)."""
    M, K = a.shape
    Kb, Nb = b.shape
    assert K == Kb and M % tm == 0 and K % tk == 0
    n_m, n_k = M // tm, K // tk
    Nw = w.shape[1] if w is not None else Nb

    b_full = (n_k == 1) or (b.size * b.dtype.itemsize <= _B_RESIDENT_BUDGET)
    if b_full:
        b_spec = pl.BlockSpec((K, Nb), lambda i, k: (0, 0))
    else:
        b_spec = pl.BlockSpec((tk, Nb), lambda i, k: (k, 0))

    in_specs = [pl.BlockSpec((tm, tk), lambda i, k: (i, k)), b_spec]
    operands = [a, b]
    if w is not None:
        in_specs.append(pl.BlockSpec((w.shape[0], Nw), lambda i, k: (0, 0)))
        operands.append(w)

    if dual_out:
        out_shape = (jax.ShapeDtypeStruct((M, Nw), out_dtype),
                     jax.ShapeDtypeStruct((M, Nw), jnp.bfloat16))
        out_specs = (pl.BlockSpec((tm, Nw), lambda i, k: (i, 0)),
                     pl.BlockSpec((tm, Nw), lambda i, k: (i, 0)))
    else:
        out_shape = jax.ShapeDtypeStruct((M, Nw), out_dtype)
        out_specs = pl.BlockSpec((tm, Nw), lambda i, k: (i, 0))

    scratch_shapes = [pltpu.VMEM((tm, Nb), jnp.float32)] if n_k > 1 else []

    a_bytes = 2 * tm * tk * a.dtype.itemsize
    b_bytes = (K * Nb if b_full else 2 * tk * Nb) * b.dtype.itemsize
    w_bytes = (w.size * w.dtype.itemsize) if w is not None else 0
    o_bytes = 2 * tm * Nw * (jnp.dtype(out_dtype).itemsize + (2 if dual_out else 0))
    s_bytes = (tm * Nb * 4) if n_k > 1 else 0
    vmem_req = 2 * (a_bytes + b_bytes + w_bytes + o_bytes + s_bytes)

    kernel = functools.partial(
        _narrow_mm_kernel, n_k=n_k, b_full=b_full, tk=tk,
        activation=activation, has_w=w is not None, dual_out=dual_out)

    return pl.pallas_call(
        kernel,
        out_shape=out_shape,
        grid_spec=pltpu.PrefetchScalarGridSpec(
            num_scalar_prefetch=0,
            grid=(n_m, n_k),
            in_specs=in_specs,
            out_specs=out_specs,
            scratch_shapes=scratch_shapes,
        ),
        compiler_params=pltpu.CompilerParams(
            dimension_semantics=("parallel", "arbitrary"),
            vmem_limit_bytes=_vmem_limit(vmem_req),
        ),
    )(*operands)


# ---------------------------------------------------------------------------
# Tiled path, kernel B: decoder pred = z @ z.T ; K = H2p = one tile always.
# ---------------------------------------------------------------------------
def _decoder_kernel(a_ref, b_ref, o_ref, *, tn, b_full):
    if b_full:
        j = pl.program_id(1)
        b_blk = b_ref[pl.ds(pl.multiple_of(j * tn, 128), tn), :]
    else:
        b_blk = b_ref[...]
    # TODO(synk): on v7x verify this last-vs-last contraction does not lower to a
    # per-tile vxpose; if it does, emit a pre-transposed z from the gc2 kernel.
    o_ref[...] = jax.lax.dot_general(
        a_ref[...], b_blk,
        dimension_numbers=(((1,), (1,)), ((), ())),
        preferred_element_type=jnp.float32).astype(o_ref.dtype)


def _decoder_matmul(z16, *, out_dtype, tm, tn):
    M, D = z16.shape
    assert M % tm == 0 and M % tn == 0
    n_m, n_n = M // tm, M // tn

    b_full = z16.size * z16.dtype.itemsize <= _B_RESIDENT_BUDGET
    b_spec = (pl.BlockSpec((M, D), lambda i, j: (0, 0)) if b_full
              else pl.BlockSpec((tn, D), lambda i, j: (j, 0)))

    a_bytes = 2 * tm * D * z16.dtype.itemsize
    b_bytes = (M * D if b_full else 2 * tn * D) * z16.dtype.itemsize
    o_bytes = 2 * tm * tn * jnp.dtype(out_dtype).itemsize
    vmem_req = 2 * (a_bytes + b_bytes + o_bytes)

    kernel = functools.partial(_decoder_kernel, tn=tn, b_full=b_full)
    return pl.pallas_call(
        kernel,
        out_shape=jax.ShapeDtypeStruct((M, M), out_dtype),
        grid_spec=pltpu.PrefetchScalarGridSpec(
            num_scalar_prefetch=0,
            grid=(n_m, n_n),
            in_specs=[pl.BlockSpec((tm, D), lambda i, j: (i, 0)), b_spec],
            out_specs=pl.BlockSpec((tm, tn), lambda i, j: (i, j)),
        ),
        compiler_params=pltpu.CompilerParams(
            dimension_semantics=("parallel", "parallel"),
            vmem_limit_bytes=_vmem_limit(vmem_req),
        ),
    )(z16, z16)


# ---------------------------------------------------------------------------
# Model forward
# ---------------------------------------------------------------------------
def gcn_model_ae_forward(x, adj, w1, w2, *, pred_dtype=jnp.bfloat16,
                         force_tiled=False):
    """Pallas GCNModelAE.forward(x, adj) -> (pred_logits, z).

    pred_dtype: dtype of the N x N logits (bf16 default halves the largest HBM
    stream; pass jnp.float32 for bit-for-bit f32 logits).
    """
    N, F = x.shape
    H1, H2 = w1.shape[1], w2.shape[1]

    # Pad ONCE: node/feature dims to 128 multiples, hidden dims to a full
    # 128-lane (no narrow <128-lane stores). Padded rows/cols are zero -> inert.
    Np, Fp = _round_up(N, 128), _round_up(F, 128)
    H1p, H2p = _round_up(H1, 128), _round_up(H2, 128)

    # bf16 MXU inputs; all accumulation inside the kernels is f32.
    xb = _pad2(x, Np, Fp).astype(jnp.bfloat16)
    adjb = _pad2(adj, Np, Np).astype(jnp.bfloat16)
    w1b = _pad2(w1, Fp, H1p).astype(jnp.bfloat16)
    w2b = _pad2(w2, H1p, H2p).astype(jnp.bfloat16)

    fused_bytes = (2 * Np * Fp + 2 * Np * Np                       # x, adj (bf16)
                   + 2 * (Fp * H1p + H1p * H2p)                    # weights
                   + 4 * Np * H2p                                  # z (f32)
                   + (4 + jnp.dtype(pred_dtype).itemsize) * Np * Np  # pred tmp+out
                   + 8 * Np * H1p)                                 # f32 intermediates

    if (not force_tiled) and fused_bytes <= _FUSED_VMEM_BUDGET:
        # Whole forward in one pallas_call, everything VMEM-resident.
        pred_p, z_p = pl.pallas_call(
            _fused_fwd_kernel,
            out_shape=(jax.ShapeDtypeStruct((Np, Np), pred_dtype),
                       jax.ShapeDtypeStruct((Np, H2p), jnp.float32)),
            in_specs=[pl.BlockSpec(memory_space=pltpu.MemorySpace.VMEM)] * 4,
            out_specs=(pl.BlockSpec(memory_space=pltpu.MemorySpace.VMEM),
                       pl.BlockSpec(memory_space=pltpu.MemorySpace.VMEM)),
            compiler_params=pltpu.CompilerParams(
                vmem_limit_bytes=_vmem_limit(2 * fused_bytes)),
        )(xb, adjb, w1b, w2b)
    else:
        t_node = _pick_tile(Np)   # node-dim tile (M of outputs, K of adj matmuls)
        t_feat = _pick_tile(Fp)   # feature-dim tile (K of x @ W1)

        # gc1 fused: hw2 = relu(adj @ (x @ W1)) @ W2  (hidden1 never hits HBM).
        xw1 = _narrow_matmul(xb, w1b, out_dtype=jnp.bfloat16, tm=t_node, tk=t_feat)
        hw2 = _narrow_matmul(adjb, xw1, w=w2b, activation="relu",
                             out_dtype=jnp.bfloat16, tm=t_node, tk=t_node)
        # gc2: z = adj @ hw2 ; emit f32 (returned) and bf16 (decoder feed) at once.
        z_p, z16 = _narrow_matmul(adjb, hw2, dual_out=True,
                                  out_dtype=jnp.float32, tm=t_node, tk=t_node)
        # dc: pred = z @ z.T (logits).
        pred_p = _decoder_matmul(z16, out_dtype=pred_dtype, tm=t_node, tn=t_node)

    pred = pred_p if Np == N else pred_p[:N, :N]
    z = z_p if (Np, H2p) == (N, H2) else z_p[:N, :H2]
    return pred, z


def glorot_init(key, shape):
    fan_in, fan_out = shape
    limit = jnp.sqrt(6.0 / (fan_in + fan_out))
    return jax.random.uniform(key, shape, jnp.float32, -limit, limit)


if __name__ == "__main__":
    root = jax.random.PRNGKey(0)
    keys = jax.random.split(root, 8)

    def make_graph(kx, ka, n, f):
        x = jax.random.normal(kx, (n, f), jnp.float32)
        a_raw = (jax.random.uniform(ka, (n, n)) > 0.9).astype(jnp.float32)
        a_sym = jnp.clip(a_raw + a_raw.T, 0.0, 1.0) + jnp.eye(n, dtype=jnp.float32)
        adj = a_sym / jnp.sum(a_sym, axis=1, keepdims=True)
        return x, adj

    def reference(x, adj, w1, w2):
        h1 = jnp.maximum(adj @ (x @ w1), 0.0)
        z = adj @ (h1 @ w2)
        return z @ z.T, z

    def nerr(got, ref):
        got = got.astype(jnp.float32)
        return float(jnp.max(jnp.abs(got - ref)) / (jnp.max(jnp.abs(ref)) + 1e-12))

    # --- test 1: small graph -> fully fused single-pallas_call path ---
    N, F_IN, H1, H2 = 128, 256, 128, 64
    x, adj = make_graph(keys[0], keys[1], N, F_IN)
    w1 = glorot_init(keys[2], (F_IN, H1))
    w2 = glorot_init(keys[3], (H1, H2))

    fwd = jax.jit(gcn_model_ae_forward)
    pred, z = fwd(x, adj, w1, w2)
    jax.block_until_ready((pred, z))
    assert pred.shape == (N, N) and z.shape == (N, H2)
    pred_ref, z_ref = reference(x, adj, w1, w2)
    assert nerr(z, z_ref) < 3e-2, ("z mismatch (fused)", nerr(z, z_ref))
    assert nerr(pred, pred_ref) < 3e-2, ("pred mismatch (fused)", nerr(pred, pred_ref))

    # --- test 2: ragged medium graph -> tiled multi-K / resident-B path ---
    N2, F2, H1b, H2b = 640, 200, 96, 48
    x2, adj2 = make_graph(keys[4], keys[5], N2, F2)
    w1b_ = glorot_init(keys[6], (F2, H1b))
    w2b_ = glorot_init(keys[7], (H1b, H2b))

    fwd_tiled = jax.jit(functools.partial(gcn_model_ae_forward, force_tiled=True))
    pred2, z2 = fwd_tiled(x2, adj2, w1b_, w2b_)
    jax.block_until_ready((pred2, z2))
    assert pred2.shape == (N2, N2) and z2.shape == (N2, H2b)
    pred2_ref, z2_ref = reference(x2, adj2, w1b_, w2b_)
    assert nerr(z2, z2_ref) < 3e-2, ("z mismatch (tiled)", nerr(z2, z2_ref))
    assert nerr(pred2, pred2_ref) < 3e-2, ("pred mismatch (tiled)", nerr(pred2, pred2_ref))

    print("KERNEL_OK")
</pallas_src>

<mosaic_0001>
module attributes {stable_mosaic.version = 11 : i64} {
  func.func @_fused_fwd_kernel(%arg0: memref<128x256xbf16, #tpu.memory_space<vmem>>, %arg1: memref<128x128xbf16, #tpu.memory_space<vmem>>, %arg2: memref<256x128xbf16, #tpu.memory_space<vmem>>, %arg3: memref<128x128xbf16, #tpu.memory_space<vmem>>, %arg4: memref<128x128xbf16, #tpu.memory_space<vmem>>, %arg5: memref<128x128xf32, #tpu.memory_space<vmem>>) attributes {dimension_semantics = [], scalar_prefetch = 0 : i64, scratch_operands = 0 : i64, tpu.core_type = #tpu.core_type<tc>} {
    %c0 = arith.constant 0 : index
    %c0_0 = arith.constant 0 : index
    %0 = vector.load %arg1[%c0, %c0_0] : memref<128x128xbf16, #tpu.memory_space<vmem>>, vector<128x128xbf16>
    %c0_1 = arith.constant 0 : index
    %c0_2 = arith.constant 0 : index
    %1 = vector.load %arg0[%c0_1, %c0_2] : memref<128x256xbf16, #tpu.memory_space<vmem>>, vector<128x256xbf16>
    %c0_3 = arith.constant 0 : index
    %c0_4 = arith.constant 0 : index
    %2 = vector.load %arg2[%c0_3, %c0_4] : memref<256x128xbf16, #tpu.memory_space<vmem>>, vector<256x128xbf16>
    %cst = arith.constant dense<0.000000e+00> : vector<128x128xf32>
    %3 = tpu.matmul %1, %2, %cst {dimension_numbers = #tpu.dot_dimension_numbers<[1], [0], [0], [1], [0, 0, 1, 1], [], []>} : vector<128x256xbf16>, vector<256x128xbf16>, vector<128x128xf32> -> vector<128x128xf32>
    %4 = arith.truncf %3 : vector<128x128xf32> to vector<128x128xbf16>
    %cst_5 = arith.constant dense<0.000000e+00> : vector<128x128xf32>
    %5 = tpu.matmul %0, %4, %cst_5 {dimension_numbers = #tpu.dot_dimension_numbers<[1], [0], [0], [1], [0, 0, 1, 1], [], []>} : vector<128x128xbf16>, vector<128x128xbf16>, vector<128x128xf32> -> vector<128x128xf32>
    %cst_6 = arith.constant 0.000000e+00 : f32
    %6 = vector.broadcast %cst_6 : f32 to vector<128x128xf32>
    %7 = arith.maximumf %5, %6 : vector<128x128xf32>
    %8 = arith.truncf %7 : vector<128x128xf32> to vector<128x128xbf16>
    %c0_7 = arith.constant 0 : index
    %c0_8 = arith.constant 0 : index
    %9 = vector.load %arg3[%c0_7, %c0_8] : memref<128x128xbf16, #tpu.memory_space<vmem>>, vector<128x128xbf16>
    %cst_9 = arith.constant dense<0.000000e+00> : vector<128x128xf32>
    %10 = tpu.matmul %8, %9, %cst_9 {dimension_numbers = #tpu.dot_dimension_numbers<[1], [0], [0], [1], [0, 0, 1, 1], [], []>} : vector<128x128xbf16>, vector<128x128xbf16>, vector<128x128xf32> -> vector<128x128xf32>
    %11 = arith.truncf %10 : vector<128x128xf32> to vector<128x128xbf16>
    %cst_10 = arith.constant dense<0.000000e+00> : vector<128x128xf32>
    %12 = tpu.matmul %0, %11, %cst_10 {dimension_numbers = #tpu.dot_dimension_numbers<[1], [0], [0], [1], [0, 0, 1, 1], [], []>} : vector<128x128xbf16>, vector<128x128xbf16>, vector<128x128xf32> -> vector<128x128xf32>
    %c0_11 = arith.constant 0 : index
    %c0_12 = arith.constant 0 : index
    %13 = vector.load %arg5[%c0_11, %c0_12] : memref<128x128xf32, #tpu.memory_space<vmem>>, vector<128x128xf32>
    tpu.vector_store %arg5[%c0_11, %c0_12], %12 {strides = array<i32>} : memref<128x128xf32, #tpu.memory_space<vmem>>, vector<128x128xf32>,
    %14 = arith.truncf %12 : vector<128x128xf32> to vector<128x128xbf16>
    %cst_13 = arith.constant dense<0.000000e+00> : vector<128x128xf32>
    %15 = tpu.matmul %14, %14, %cst_13 {dimension_numbers = #tpu.dot_dimension_numbers<[1], [1], [0], [0], [0, 0, 1, 0], [], []>} : vector<128x128xbf16>, vector<128x128xbf16>, vector<128x128xf32> -> vector<128x128xf32>
    %16 = arith.truncf %15 : vector<128x128xf32> to vector<128x128xbf16>
    %c0_14 = arith.constant 0 : index
    %c0_15 = arith.constant 0 : index
    %17 = vector.load %arg4[%c0_14, %c0_15] : memref<128x128xbf16, #tpu.memory_space<vmem>>, vector<128x128xbf16>
    tpu.vector_store %arg4[%c0_14, %c0_15], %16 {strides = array<i32>} : memref<128x128xbf16, #tpu.memory_space<vmem>>, vector<128x128xbf16>,
    return
  }
}

</mosaic_0001>

<bundles_post_ra>
// kernel: gcn_model_ae_forward.1
= control target key start
LH: loop header
LB: loop body
LE: loop exit
PB: predicated region body
PF: predicated region fallthrough
CT: control target
= control target key end

     0   :  { %s1753_s0 = inlined_call_operand.vmem [shape: bf16[128,256], index: 0, kind: input, shape index: {}]   ;;  %s1754_s1 = inlined_call_operand.vmem [shape: bf16[128,128], index: 1, kind: input, shape index: {}]   ;;  %s1755_s2 = inlined_call_operand.vmem [shape: bf16[256,128], index: 2, kind: input, shape index: {}]   ;;  %s1756_s3 = inlined_call_operand.vmem [shape: bf16[128,128], index: 3, kind: input, shape index: {}]   ;;  %s1757_s4 = inlined_call_operand.hbm [shape: bf16[128,128], index: 4, kind: output, shape index: {0}]   ;;  %s1758_s5 = inlined_call_operand.vmem [shape: f32[128,128], index: 5, kind: output, shape index: {1}]  }
   0x1   :  { %v1408_v0 = vld [vmem:[%s1755_s2 + $0x40] sm:$0xff]   ;;  %v1410_v2 = vld [vmem:[%s1755_s2 + $0x48] sm:$0xff]   ;;  %v1412_v4 = vld [vmem:[%s1755_s2 + $0x50] sm:$0xff]  }
   0x2   :  { %v1409_v1 = vld [vmem:[%s1755_s2] sm:$0xff]   ;;  %1149 = vmatprep.subr.bf16.mxu0 %v1408_v0  ;;  %v1411_v3 = vld [vmem:[%s1755_s2 + $0x8] sm:$0xff]   ;;  %v1413_v5 = vld [vmem:[%s1755_s2 + $0x10] sm:$0xff]  }
   0x3   :  { %1150 = vmatpush3.bf16.msra.mxu0 %v1409_v1  ;;  %v1414_v6 = vld [vmem:[%s1755_s2 + $0x58] sm:$0xff]   ;;  %v1416_v8 = vld [vmem:[%s1755_s2 + $0x60] sm:$0xff]   ;;  %v1418_v10 = vld [vmem:[%s1755_s2 + $0x68] sm:$0xff]  }
   0x4   :  { %1151 = vmatprep.subr.bf16.mxu0 %v1410_v2  ;;  %v1415_v7 = vld [vmem:[%s1755_s2 + $0x18] sm:$0xff]   ;;  %v1417_v9 = vld [vmem:[%s1755_s2 + $0x20] sm:$0xff]   ;;  %v1419_v12 = vld [vmem:[%s1755_s2 + $0x28] sm:$0xff]  }
   0x5   :  { %v1426_v11 = vld [vmem:[%s1753_s0 + $0x4] ss:$8 sps:$4 sm:$0xff]   ;;  %v1420_v13 = vld [vmem:[%s1755_s2 + $0x70] sm:$0xff]   ;;  %v1422_v15 = vld [vmem:[%s1755_s2 + $0x78] sm:$0xff]  }
   0x6   :  { %293 = vmatprep.mubr.bf16.mxu0 %v1426_v11  ;;  %v1421_v14 = vld [vmem:[%s1755_s2 + $0x30] sm:$0xff]   ;;  %v1423_v16 = vld [vmem:[%s1755_s2 + $0x38] sm:$0xff]   ;;  %v1424_v17 = vld [vmem:[%s1753_s0] ss:$8 sps:$4 sm:$0xff]  }
   0x7   :  { %1152 = vmatpush3.bf16.msra.mxu0 %v1411_v3  ;;  %v1427_v18 = vld [vmem:[%s1753_s0 + $0x14] ss:$8 sps:$4 sm:$0xff]  }
   0x8   :  { %1153 = vmatprep.subr.bf16.mxu0 %v1412_v4 }
   0xb   :  { %1154 = vmatpush3.bf16.msra.mxu0 %v1413_v5 }
   0xc   :  { %1155 = vmatprep.subr.bf16.mxu0 %v1414_v6 }
   0xf   :  { %1156 = vmatpush3.bf16.msra.mxu0 %v1415_v7 }
  0x10   :  { %1157 = vmatprep.subr.bf16.mxu0 %v1416_v8 }
  0x13   :  { %1158 = vmatpush3.bf16.msra.mxu0 %v1417_v9 }
  0x14   :  { %1159 = vmatprep.subr.bf16.mxu0 %v1418_v10 }
  0x17   :  { %1160 = vmatpush3.bf16.msra.mxu0 %v1419_v12 }
  0x18   :  { %1161 = vmatprep.subr.bf16.mxu0 %v1420_v13 }
  0x1b   :  { %1162 = vmatpush3.bf16.msra.mxu0 %v1421_v14 }
  0x1c   :  { %1163 = vmatprep.subr.bf16.mxu0 %v1422_v15 }
  0x1f   :  { %1164 = vmatpush3.bf16.msra.mxu0 %v1423_v16 }
  0x22   :  { %294 = vmatmul.mubr.bf16.vlgmr.msra.gmra.mrb[0].mxu0 %v1424_v17 }
  0x23   :  { %301 = vmatprep.mubr.bf16.mxu0 %v1427_v18 }
  0x24   :  { %11 = vsyncpa [#allocation3], 0  ;;  %v1429_v19 = vld [vmem:[%s1753_s0 + $0x10] ss:$8 sps:$4 sm:$0xff]   ;;  %v1430_v20 = vld [vmem:[%s1753_s0 + $0x24] ss:$8 sps:$4 sm:$0xff]  }
  0x25   :  { %v1432_v21 = vld [vmem:[%s1753_s0 + $0x20] ss:$8 sps:$4 sm:$0xff]   ;;  %v1433_v22 = vld [vmem:[%s1753_s0 + $0x34] ss:$8 sps:$4 sm:$0xff]   ;;  %v1435_v23 = vld [vmem:[%s1753_s0 + $0x30] ss:$8 sps:$4 sm:$0xff]  }
  0x26   :  { %v1436_v24 = vld [vmem:[%s1753_s0 + $0x44] ss:$8 sps:$4 sm:$0xff]   ;;  %v1438_v25 = vld [vmem:[%s1753_s0 + $0x40] ss:$8 sps:$4 sm:$0xff]   ;;  %v1439_v26 = vld [vmem:[%s1753_s0 + $0x54] ss:$8 sps:$4 sm:$0xff]  }
  0x27   :  { %v1441_v27 = vld [vmem:[%s1753_s0 + $0x50] ss:$8 sps:$4 sm:$0xff]   ;;  %v1442_v28 = vld [vmem:[%s1753_s0 + $0x64] ss:$8 sps:$4 sm:$0xff]   ;;  %v1444_v29 = vld [vmem:[%s1753_s0 + $0x60] ss:$8 sps:$4 sm:$0xff]  }
  0x28   :  { %v1445_v30 = vld [vmem:[%s1753_s0 + $0x74] ss:$8 sps:$4 sm:$0xff]   ;;  %v1447_v31 = vld [vmem:[%s1753_s0 + $0x70] ss:$8 sps:$4 sm:$0xff]   ;;  %v1448_v32 = vld [vmem:[%s1754_s1] sm:$0xff]  }
  0x29   :  { %1293 = vmatprep.mubr.bf16.mxu1 %v1448_v32 }
  0x2a   :  { %302 = vmatmul.mubr.bf16.gmra.mrb[4].mxu0 %v1429_v19 }
  0x2b   :  { %309 = vmatprep.mubr.bf16.mxu0 %v1430_v20 }
  0x32   :  { %310 = vmatmul.mubr.bf16.gmra.mrb[8].mxu0 %v1432_v21 }
  0x33   :  { %317 = vmatprep.mubr.bf16.mxu0 %v1433_v22 }
  0x3a   :  { %318 = vmatmul.mubr.bf16.gmra.mrb[12].mxu0 %v1435_v23 }
  0x3b   :  { %325 = vmatprep.mubr.bf16.mxu0 %v1436_v24 }
  0x42   :  { %326 = vmatmul.mubr.bf16.gmra.mrb[16].mxu0 %v1438_v25  ;;  %v1456_v25 = vld [vmem:[%s1756_s3] sm:$0xff]  }
  0x43   :  { %333 = vmatprep.mubr.bf16.mxu0 %v1439_v26  ;;  %v1626_v26 = vld [vmem:[%s1754_s1 + $0x8] sm:$0xff]  }
  0x4a   :  { %334 = vmatmul.mubr.bf16.gmra.mrb[20].mxu0 %v1441_v27  ;;  %v1631_v27 = vld [vmem:[%s1754_s1 + $0x10] sm:$0xff]  }
  0x4b   :  { %341 = vmatprep.mubr.bf16.mxu0 %v1442_v28  ;;  %v1457_v28 = vld [vmem:[%s1756_s3 + $0x8] sm:$0xff]  }
  0x52   :  { %342 = vmatmul.mubr.bf16.gmra.mrb[24].mxu0 %v1444_v29  ;;  %v1458_v29 = vld [vmem:[%s1756_s3 + $0x10] sm:$0xff]  }
  0x53   :  { %349 = vmatprep.mubr.bf16.mxu0 %v1445_v30  ;;  %v1644_v30 = vld [vmem:[%s1754_s1 + $0x18] sm:$0xff]  }
  0x5a   :  { %350 = vmatmul.mubr.bf16.gmra.mrb[28].mxu0 %v1447_v31  ;;  %v1649_v31 = vld [vmem:[%s1754_s1 + $0x20] sm:$0xff]  }
  0x5b   :  { %1357 = vmatprep.mubr.bf16.mxu0 %v1448_v32  ;;  %v1459_v32 = vld [vmem:[%s1756_s3 + $0x18] sm:$0xff]  }
  0xf5   :  { %v1165_v33 = vpop.f32.mrb[0].mxu0 }
  0xf6   :  { %v1166_v34 = vpop.f32.mrb[1].mxu0 }
  0xf7   :  { %v1167_v35 = vadd.f32 %v1166_v34, %v1165_v33  ;;  %v1168_v36 = vpop.f32.mrb[2].mxu0  ;;  %v1460_v33 = vld [vmem:[%s1756_s3 + $0x20] sm:$0xff]   ;;  %v1662_v34 = vld [vmem:[%s1754_s1 + $0x28] sm:$0xff]  }
  0xf8   :  { %v1169_v37 = vpop.f32.mrb[3].mxu0 }
  0xf9   :  { %v1170_v38 = vadd.f32 %v1169_v37, %v1168_v36  ;;  %v1461_v36 = vld [vmem:[%s1756_s3 + $0x28] sm:$0xff]   ;;  %v1677_v37 = vld [vmem:[%s1754_s1 + $0x38] sm:$0xff]  }
  0xfb   :  { %v358_v39 = vpack.c.bf16 %v1170_v38, %v1167_v35  ;;  %v1667_v35 = vld [vmem:[%s1754_s1 + $0x30] sm:$0xff]  }
  0xfc   :  { %v1462_v38 = vld [vmem:[%s1756_s3 + $0x30] sm:$0xff]  }
  0xfd   :  { %v1171_v40 = vpop.f32.mrb[4].mxu0  ;;  %1277 = vmatprep.subr.bf16.mxu1 %v358_v39 }
  0xfe   :  { %v1172_v41 = vpop.f32.mrb[5].mxu0  ;;  %1278 = vmatpush3.bf16.msra.mxu1 %v358_v39  ;;  %v1463_v39 = vld [vmem:[%s1756_s3 + $0x38] sm:$0xff]  }
  0xff   :  { %v1173_v42 = vadd.f32 %v1172_v41, %v1171_v40  ;;  %v1174_v43 = vpop.f32.mrb[6].mxu0 }
 0x100   :  { %v1175_v44 = vpop.f32.mrb[7].mxu0 }
 0x101   :  { %v1176_v45 = vadd.f32 %v1175_v44, %v1174_v43 }
 0x103   :  { %v359_v46 = vpack.c.bf16 %v1176_v45, %v1173_v42 }
 0x105   :  { %v1177_v47 = vpop.f32.mrb[8].mxu0  ;;  %1279 = vmatprep.subr.bf16.mxu1 %v359_v46 }
 0x106   :  { %v1178_v48 = vpop.f32.mrb[9].mxu0  ;;  %1280 = vmatpush3.bf16.msra.mxu1 %v359_v46 }
 0x107   :  { %v1179_v49 = vadd.f32 %v1178_v48, %v1177_v47  ;;  %v1180_v50 = vpop.f32.mrb[10].mxu0 }
 0x108   :  { %v1181_v51 = vpop.f32.mrb[11].mxu0 }
 0x109   :  { %v1182_v52 = vadd.f32 %v1181_v51, %v1180_v50 }
 0x10b   :  { %v360_v53 = vpack.c.bf16 %v1182_v52, %v1179_v49 }
 0x10d   :  { %v1183_v54 = vpop.f32.mrb[12].mxu0  ;;  %1281 = vmatprep.subr.bf16.mxu1 %v360_v53 }
 0x10e   :  { %v1184_v55 = vpop.f32.mrb[13].mxu0  ;;  %1282 = vmatpush3.bf16.msra.mxu1 %v360_v53 }
 0x10f   :  { %v1185_v56 = vadd.f32 %v1184_v55, %v1183_v54  ;;  %v1186_v57 = vpop.f32.mrb[14].mxu0 }
 0x110   :  { %v1187_v58 = vpop.f32.mrb[15].mxu0 }
 0x111   :  { %v1188_v59 = vadd.f32 %v1187_v58, %v1186_v57 }
 0x113   :  { %v361_v60 = vpack.c.bf16 %v1188_v59, %v1185_v56 }
 0x115   :  { %v1189_v61 = vpop.f32.mrb[16].mxu0  ;;  %1283 = vmatprep.subr.bf16.mxu1 %v361_v60 }
 0x116   :  { %v1190_v62 = vpop.f32.mrb[17].mxu0  ;;  %1284 = vmatpush3.bf16.msra.mxu1 %v361_v60 }
 0x117   :  { %v1191_v63 = vadd.f32 %v1190_v62, %v1189_v61  ;;  %v1192_v0 = vpop.f32.mrb[18].mxu0 }
 0x118   :  { %v1193_v1 = vpop.f32.mrb[19].mxu0 }
 0x119   :  { %v1194_v2 = vadd.f32 %v1193_v1, %v1192_v0 }
 0x11b   :  { %v362_v3 = vpack.c.bf16 %v1194_v2, %v1191_v63 }
 0x11d   :  { %v1195_v4 = vpop.f32.mrb[20].mxu0  ;;  %1285 = vmatprep.subr.bf16.mxu1 %v362_v3 }
 0x11e   :  { %v1196_v5 = vpop.f32.mrb[21].mxu0  ;;  %1286 = vmatpush3.bf16.msra.mxu1 %v362_v3 }
 0x11f   :  { %v1197_v6 = vadd.f32 %v1196_v5, %v1195_v4  ;;  %v1198_v7 = vpop.f32.mrb[22].mxu0 }
 0x120   :  { %v1199_v8 = vpop.f32.mrb[23].mxu0 }
 0x121   :  { %v1200_v9 = vadd.f32 %v1199_v8, %v1198_v7 }
 0x123   :  { %v363_v10 = vpack.c.bf16 %v1200_v9, %v1197_v6 }
 0x125   :  { %v1201_v11 = vpop.f32.mrb[24].mxu0  ;;  %1287 = vmatprep.subr.bf16.mxu1 %v363_v10 }
 0x126   :  { %v1202_v12 = vpop.f32.mrb[25].mxu0  ;;  %1288 = vmatpush3.bf16.msra.mxu1 %v363_v10 }
 0x127   :  { %v1203_v13 = vadd.f32 %v1202_v12, %v1201_v11  ;;  %v1204_v14 = vpop.f32.mrb[26].mxu0 }
 0x128   :  { %v1205_v15 = vpop.f32.mrb[27].mxu0 }
 0x129   :  { %v1206_v16 = vadd.f32 %v1205_v15, %v1204_v14 }
 0x12b   :  { %v364_v17 = vpack.c.bf16 %v1206_v16, %v1203_v13 }
 0x12d   :  { %v1207_v18 = vpop.f32.mrb[28].mxu0  ;;  %1289 = vmatprep.subr.bf16.mxu1 %v364_v17 }
 0x12e   :  { %v1208_v19 = vpop.f32.mrb[29].mxu0  ;;  %1290 = vmatpush3.bf16.msra.mxu1 %v364_v17 }
 0x12f   :  { %v1209_v20 = vadd.f32 %v1208_v19, %v1207_v18  ;;  %v1210_v21 = vpop.f32.mrb[30].mxu0 }
 0x130   :  { %v1211_v22 = vpop.f32.mrb[31].mxu0 }
 0x131   :  { %v1212_v23 = vadd.f32 %v1211_v22, %v1210_v21 }
 0x133   :  { %v365_v24 = vpack.c.bf16 %v1212_v23, %v1209_v20 }
 0x135   :  { %1291 = vmatprep.subr.bf16.mxu1 %v365_v24 }
 0x136   :  { %1292 = vmatpush3.bf16.msra.mxu1 %v365_v24 }
 0x137   :  { %1309 = vmatprep.subr.bf16.mxu1 %v1456_v25 }
 0x139   :  { %1294 = vmatmul.mubr.bf16.vlgmr.msra.gmra.mrb[0].mxu1 %v1626_v26 }
 0x13a   :  { %1297 = vmatprep.mubr.bf16.mxu1 %v1631_v27  ;;  %1310 = vmatpush3.bf16.msra.mxu1 %v1456_v25 }
 0x13b   :  { %1311 = vmatprep.subr.bf16.mxu1 %v1457_v28 }
 0x13e   :  { %1312 = vmatpush3.bf16.msra.mxu1 %v1457_v28 }
 0x13f   :  { %1313 = vmatprep.subr.bf16.mxu1 %v1458_v29 }
 0x141   :  { %1298 = vmatmul.mubr.bf16.gmra.mrb[4].mxu1 %v1644_v30 }
 0x142   :  { %1301 = vmatprep.mubr.bf16.mxu1 %v1649_v31  ;;  %1314 = vmatpush3.bf16.msra.mxu1 %v1458_v29 }
 0x143   :  { %1315 = vmatprep.subr.bf16.mxu1 %v1459_v32 }
 0x146   :  { %1316 = vmatpush3.bf16.msra.mxu1 %v1459_v32 }
 0x147   :  { %1317 = vmatprep.subr.bf16.mxu1 %v1460_v33 }
 0x149   :  { %1302 = vmatmul.mubr.bf16.gmra.mrb[8].mxu1 %v1662_v34 }
 0x14a   :  { %1305 = vmatprep.mubr.bf16.mxu1 %v1667_v35  ;;  %1318 = vmatpush3.bf16.msra.mxu1 %v1460_v33 }
 0x14b   :  { %1319 = vmatprep.subr.bf16.mxu1 %v1461_v36 }
 0x14e   :  { %1320 = vmatpush3.bf16.msra.mxu1 %v1461_v36 }
 0x14f   :  { %1321 = vmatprep.subr.bf16.mxu1 %v1462_v38 }
 0x151   :  { %1306 = vmatmul.mubr.bf16.gmra.mrb[12].mxu1 %v1677_v37 }
 0x152   :  { %1322 = vmatpush3.bf16.msra.mxu1 %v1462_v38 }
 0x153   :  { %1323 = vmatprep.subr.bf16.mxu1 %v1463_v39 }
 0x156   :  { %1324 = vmatpush3.bf16.msra.mxu1 %v1463_v39 }
 0x20c   :  { %v1295_v40 = vpop.f32.mrb[0].mxu1 }
 0x20d   :  { %v448_v41 = vpop.f32.mrb[1].mxu1  ;;  %v513_v43 = vmax.f32 %v1295_v40, 0.0 }
 0x20e   :  { %v1296_v42 = vpop.f32.mrb[2].mxu1  ;;  %v511_v46 = vmax.f32 %v448_v41, 0.0 }
 0x20f   :  { %v514_v44 = vmax.f32 %v1296_v42, 0.0  ;;  %v451_v45 = vpop.f32.mrb[3].mxu1 }
 0x210   :  { %v512_v47 = vmax.f32 %v451_v45, 0.0 }
 0x211   :  { %v528_v48 = vpack.c.bf16 %v514_v44, %v513_v43 }
 0x212   :  { %v527_v49 = vpack.c.bf16 %v512_v47, %v511_v46 }
 0x214   :  { %v1299_v50 = vpop.f32.mrb[4].mxu1  ;;  %1325 = vmatprep.mubr.bf16.mxu1 %v527_v49 }
 0x215   :  { %v464_v51 = vpop.f32.mrb[5].mxu1  ;;  %1326 = vmatmul.mubr.bf16.vlgmr.msra.gmra.mrb[16].mxu1 %v528_v48  ;;  %v517_v53 = vmax.f32 %v1299_v50, 0.0 }
 0x216   :  { %v1300_v52 = vpop.f32.mrb[6].mxu1  ;;  %v515_v56 = vmax.f32 %v464_v51, 0.0 }
 0x217   :  { %v518_v54 = vmax.f32 %v1300_v52, 0.0  ;;  %v467_v55 = vpop.f32.mrb[7].mxu1 }
 0x218   :  { %v516_v57 = vmax.f32 %v467_v55, 0.0 }
 0x219   :  { %v530_v58 = vpack.c.bf16 %v518_v54, %v517_v53 }
 0x21a   :  { %v529_v59 = vpack.c.bf16 %v516_v57, %v515_v56 }
 0x21c   :  { %v1303_v60 = vpop.f32.mrb[8].mxu1  ;;  %1329 = vmatprep.mubr.bf16.mxu1 %v529_v59 }
 0x21d   :  { %v480_v61 = vpop.f32.mrb[9].mxu1  ;;  %1330 = vmatmul.mubr.bf16.gmra.mrb[20].mxu1 %v530_v58  ;;  %v521_v63 = vmax.f32 %v1303_v60, 0.0 }
 0x21e   :  { %v1304_v62 = vpop.f32.mrb[10].mxu1  ;;  %v519_v2 = vmax.f32 %v480_v61, 0.0 }
 0x21f   :  { %v522_v0 = vmax.f32 %v1304_v62, 0.0  ;;  %v483_v1 = vpop.f32.mrb[11].mxu1 }
 0x220   :  { %v520_v3 = vmax.f32 %v483_v1, 0.0 }
 0x221   :  { %v532_v4 = vpack.c.bf16 %v522_v0, %v521_v63 }
 0x222   :  { %v531_v5 = vpack.c.bf16 %v520_v3, %v519_v2 }
 0x224   :  { %v1307_v6 = vpop.f32.mrb[12].mxu1  ;;  %1333 = vmatprep.mubr.bf16.mxu1 %v531_v5 }
 0x225   :  { %v496_v7 = vpop.f32.mrb[13].mxu1  ;;  %1334 = vmatmul.mubr.bf16.gmra.mrb[24].mxu1 %v532_v4  ;;  %v525_v9 = vmax.f32 %v1307_v6, 0.0 }
 0x226   :  { %v1308_v8 = vpop.f32.mrb[14].mxu1  ;;  %v523_v12 = vmax.f32 %v496_v7, 0.0 }
 0x227   :  { %v526_v10 = vmax.f32 %v1308_v8, 0.0  ;;  %v499_v11 = vpop.f32.mrb[15].mxu1 }
 0x228   :  { %v524_v13 = vmax.f32 %v499_v11, 0.0 }
 0x229   :  { %v534_v14 = vpack.c.bf16 %v526_v10, %v525_v9 }
 0x22a   :  { %v533_v15 = vpack.c.bf16 %v524_v13, %v523_v12 }
 0x22c   :  { %1337 = vmatprep.mubr.bf16.mxu1 %v533_v15 }
 0x22d   :  { %1338 = vmatmul.mubr.bf16.gmra.mrb[28].mxu1 %v534_v14 }
 0x2e8   :  { %v1327_v16 = vpop.f32.mrb[16].mxu1 }
 0x2e9   :  { %v633_v17 = vpop.f32.mrb[17].mxu1 }
 0x2ea   :  { %v1328_v18 = vpop.f32.mrb[18].mxu1 }
 0x2eb   :  { %v697_v19 = vpack.c.bf16 %v1328_v18, %v1327_v16  ;;  %v636_v20 = vpop.f32.mrb[19].mxu1 }
 0x2ec   :  { %v696_v21 = vpack.c.bf16 %v636_v20, %v633_v17 }
 0x2ee   :  { %1341 = vmatprep.subr.bf16.mxu0 %v696_v21 }
 0x2ef   :  { %1342 = vmatpush3.bf16.msra.mxu0 %v696_v21 }
 0x2f0   :  { %v1331_v22 = vpop.f32.mrb[20].mxu1  ;;  %1343 = vmatprep.subr.bf16.mxu0 %v697_v19 }
 0x2f1   :  { %v649_v23 = vpop.f32.mrb[21].mxu1 }
 0x2f2   :  { %v1332_v24 = vpop.f32.mrb[22].mxu1 }
 0x2f3   :  { %v699_v25 = vpack.c.bf16 %v1332_v24, %v1331_v22  ;;  %v652_v28 = vpop.f32.mrb[23].mxu1  ;;  %1344 = vmatpush3.bf16.msra.mxu0 %v697_v19 }
 0x2f4   :  { %v698_v29 = vpack.c.bf16 %v652_v28, %v649_v23 }
 0x2f6   :  { %1345 = vmatprep.subr.bf16.mxu0 %v698_v29 }
 0x2f7   :  { %1346 = vmatpush3.bf16.msra.mxu0 %v698_v29 }
 0x2f8   :  { %v1335_v32 = vpop.f32.mrb[24].mxu1  ;;  %1347 = vmatprep.subr.bf16.mxu0 %v699_v25 }
 0x2f9   :  { %v665_v33 = vpop.f32.mrb[25].mxu1 }
 0x2fa   :  { %v1336_v36 = vpop.f32.mrb[26].mxu1 }
 0x2fb   :  { %v701_v38 = vpack.c.bf16 %v1336_v36, %v1335_v32  ;;  %v668_v39 = vpop.f32.mrb[27].mxu1  ;;  %1348 = vmatpush3.bf16.msra.mxu0 %v699_v25 }
 0x2fc   :  { %v700_v40 = vpack.c.bf16 %v668_v39, %v665_v33 }
 0x2fe   :  { %1349 = vmatprep.subr.bf16.mxu0 %v700_v40 }
 0x2ff   :  { %1350 = vmatpush3.bf16.msra.mxu0 %v700_v40 }
 0x300   :  { %v1339_v41 = vpop.f32.mrb[28].mxu1  ;;  %1351 = vmatprep.subr.bf16.mxu0 %v701_v38 }
 0x301   :  { %v681_v42 = vpop.f32.mrb[29].mxu1 }
 0x302   :  { %v1340_v43 = vpop.f32.mrb[30].mxu1 }
 0x303   :  { %v703_v44 = vpack.c.bf16 %v1340_v43, %v1339_v41  ;;  %v684_v45 = vpop.f32.mrb[31].mxu1  ;;  %1352 = vmatpush3.bf16.msra.mxu0 %v701_v38 }
 0x304   :  { %v702_v46 = vpack.c.bf16 %v684_v45, %v681_v42 }
 0x306   :  { %1353 = vmatprep.subr.bf16.mxu0 %v702_v46 }
 0x307   :  { %1354 = vmatpush3.bf16.msra.mxu0 %v702_v46 }
 0x308   :  { %1355 = vmatprep.subr.bf16.mxu0 %v703_v44 }
 0x30b   :  { %1356 = vmatpush3.bf16.msra.mxu0 %v703_v44 }
 0x30e   :  { %1358 = vmatmul.mubr.bf16.vlgmr.msra.gmra.mrb[32].mxu0 %v1626_v26 }
 0x30f   :  { %1361 = vmatprep.mubr.bf16.mxu0 %v1631_v27 }
 0x316   :  { %1362 = vmatmul.mubr.bf16.gmra.mrb[36].mxu0 %v1644_v30 }
 0x317   :  { %1365 = vmatprep.mubr.bf16.mxu0 %v1649_v31 }
 0x31e   :  { %1366 = vmatmul.mubr.bf16.gmra.mrb[40].mxu0 %v1662_v34 }
 0x31f   :  { %1369 = vmatprep.mubr.bf16.mxu0 %v1667_v35 }
 0x326   :  { %1370 = vmatmul.mubr.bf16.gmra.mrb[44].mxu0 %v1677_v37 }
 0x3e1   :  { %v1359_v47 = vpop.f32.mrb[32].mxu0 }
 0x3e2   :  { %803 = vst [vmem:[%s1758_s5 + $0x10] sm:$0xff] %v1359_v47  ;;  %v738_v48 = vpop.f32.mrb[33].mxu0 }
 0x3e3   :  { %801 = vst [vmem:[%s1758_s5] sm:$0xff] %v738_v48  ;;  %v1360_v26 = vpop.f32.mrb[34].mxu0 }
 0x3e4   :  { %804 = vst [vmem:[%s1758_s5 + $0x18] sm:$0xff] %v1360_v26  ;;  %v818_v27 = vpack.c.bf16 %v1360_v26, %v1359_v47  ;;  %v741_v30 = vpop.f32.mrb[35].mxu0 }
 0x3e5   :  { %802 = vst [vmem:[%s1758_s5 + $0x8] sm:$0xff] %v741_v30  ;;  %v817_v31 = vpack.c.bf16 %v741_v30, %v738_v48 }
 0x3e7   :  { %1373 = vmatprep.subr.bf16.mxu1 %v817_v31  ;;  %1389 = vmatprep.mubr.bf16.mxu1 %v817_v31 }
 0x3e8   :  { %1374 = vmatpush3.bf16.xpose.msra.mxu1 %v817_v31 }
 0x3e9   :  { %1375 = vmatprep.subr.bf16.mxu1 %v818_v27  ;;  %v1363_v34 = vpop.f32.mrb[36].mxu0 }
 0x3ea   :  { %807 = vst [vmem:[%s1758_s5 + $0x30] sm:$0xff] %v1363_v34  ;;  %v754_v35 = vpop.f32.mrb[37].mxu0 }
 0x3eb   :  { %805 = vst [vmem:[%s1758_s5 + $0x20] sm:$0xff] %v754_v35  ;;  %v1364_v37 = vpop.f32.mrb[38].mxu0 }
 0x3ec   :  { %808 = vst [vmem:[%s1758_s5 + $0x38] sm:$0xff] %v1364_v37  ;;  %v820_v49 = vpack.c.bf16 %v1364_v37, %v1363_v34  ;;  %v757_v50 = vpop.f32.mrb[39].mxu0 }
 0x3ed   :  { %806 = vst [vmem:[%s1758_s5 + $0x28] sm:$0xff] %v757_v50  ;;  %v819_v51 = vpack.c.bf16 %v757_v50, %v754_v35 }
 0x3f0   :  { %1376 = vmatpush3.bf16.xpose.msra.mxu1 %v818_v27 }
 0x3f1   :  { %1377 = vmatprep.subr.bf16.mxu1 %v819_v51  ;;  %v1367_v52 = vpop.f32.mrb[40].mxu0 }
 0x3f2   :  { %811 = vst [vmem:[%s1758_s5 + $0x50] sm:$0xff] %v1367_v52  ;;  %v770_v53 = vpop.f32.mrb[41].mxu0 }
 0x3f3   :  { %809 = vst [vmem:[%s1758_s5 + $0x40] sm:$0xff] %v770_v53  ;;  %v1368_v54 = vpop.f32.mrb[42].mxu0 }
 0x3f4   :  { %812 = vst [vmem:[%s1758_s5 + $0x58] sm:$0xff] %v1368_v54  ;;  %v822_v55 = vpack.c.bf16 %v1368_v54, %v1367_v52  ;;  %v773_v56 = vpop.f32.mrb[43].mxu0 }
 0x3f5   :  { %810 = vst [vmem:[%s1758_s5 + $0x48] sm:$0xff] %v773_v56  ;;  %v821_v57 = vpack.c.bf16 %v773_v56, %v770_v53 }
 0x3f8   :  { %1378 = vmatpush3.bf16.xpose.msra.mxu1 %v819_v51 }
 0x3f9   :  { %1379 = vmatprep.subr.bf16.mxu1 %v820_v49  ;;  %v1371_v58 = vpop.f32.mrb[44].mxu0 }
 0x3fa   :  { %815 = vst [vmem:[%s1758_s5 + $0x70] sm:$0xff] %v1371_v58  ;;  %v786_v59 = vpop.f32.mrb[45].mxu0 }
 0x3fb   :  { %813 = vst [vmem:[%s1758_s5 + $0x60] sm:$0xff] %v786_v59  ;;  %v1372_v60 = vpop.f32.mrb[46].mxu0 }
 0x3fc   :  { %816 = vst [vmem:[%s1758_s5 + $0x78] sm:$0xff] %v1372_v60  ;;  %v824_v61 = vpack.c.bf16 %v1372_v60, %v1371_v58  ;;  %v789_v62 = vpop.f32.mrb[47].mxu0 }
 0x3fd   :  { %814 = vst [vmem:[%s1758_s5 + $0x68] sm:$0xff] %v789_v62  ;;  %v823_v63 = vpack.c.bf16 %v789_v62, %v786_v59  ;;  %s1488_s5 = smov [#allocation2]  }
 0x3fe   :  { %s1007_s10 = sshll.u32 %s1488_s5, 4  ;;  %s1008_s10 = int_to_ptr.vmem [resolvable:$true] %s1007_s10 }
 0x3ff   :  { %s1464_s11 = scalar_lea.vmem %s1008_s10, 1024  ;;  %p1469_p1 = scmp.lt.s32.totalorder %s1008_s10, %s1008_s10 }
 0x400   :  { %1380 = vmatpush3.bf16.xpose.msra.mxu1 %v820_v49  ;;  %p1465_p0 = scmp.ne.s32.totalorder %s1008_s10, %s1464_s11  ;;  %p1470_p2 = scmp.lt.s32.totalorder %s1464_s11, %s1464_s11 }
 0x401   :  { %1381 = vmatprep.subr.bf16.mxu1 %v821_v57 }
 0x402   :  { %p1471_p3 = por %p1470_p2, %p1469_p1 }
 0x404   :  { %p1472_p4 = pnand %p1471_p3, %p1465_p0 }
 0x408   :  { %1382 = vmatpush3.bf16.xpose.msra.mxu1 %v821_v57 }
 0x409   :  { %1383 = vmatprep.subr.bf16.mxu1 %v822_v55 }
 0x410   :  { %1384 = vmatpush3.bf16.xpose.msra.mxu1 %v822_v55 }
 0x411   :  { %1385 = vmatprep.subr.bf16.mxu1 %v823_v63 }
 0x418   :  { %1386 = vmatpush3.bf16.xpose.msra.mxu1 %v823_v63 }
 0x419   :  { %1387 = vmatprep.subr.bf16.mxu1 %v824_v61 }
 0x420   :  { %1388 = vmatpush3.bf16.xpose.msra.mxu1 %v824_v61 }
 0x427   :  { %1390 = vmatmul.mubr.bf16.vlgmr.msra.gmra.mrb[32].mxu1 %v818_v27 }
 0x428   :  { %1393 = vmatprep.mubr.bf16.mxu1 %v819_v51 }
 0x42f   :  { %1394 = vmatmul.mubr.bf16.gmra.mrb[36].mxu1 %v820_v49 }
 0x430   :  { %1397 = vmatprep.mubr.bf16.mxu1 %v821_v57 }
 0x437   :  { %1398 = vmatmul.mubr.bf16.gmra.mrb[40].mxu1 %v822_v55 }
 0x438   :  { %1401 = vmatprep.mubr.bf16.mxu1 %v823_v63 }
 0x43f   :  { %1402 = vmatmul.mubr.bf16.gmra.mrb[44].mxu1 %v824_v61 }
 0x4fa   :  { %v1391_v0 = vpop.f32.mrb[32].mxu1 }
 0x4fb   :  { %v859_v1 = vpop.f32.mrb[33].mxu1 }
 0x4fc   :  { %v1392_v2 = vpop.f32.mrb[34].mxu1 }
 0x4fd   :  { %v1110_v3 = vpack.c.bf16 %v1392_v2, %v1391_v0  ;;  %v862_v4 = vpop.f32.mrb[35].mxu1 }
 0x4fe   :  { %v1105_v5 = vpack.c.bf16 %v862_v4, %v859_v1 }
 0x4ff   :  { %1142 = vst [vmem:[#allocation2 + $0x8] sm:$0xff] %v1110_v3  }
 0x500   :  { %1106 = vst [vmem:[#allocation2] sm:$0xff] %v1105_v5  }
 0x502   :  { %v1395_v6 = vpop.f32.mrb[36].mxu1 }
 0x503   :  { %v875_v7 = vpop.f32.mrb[37].mxu1 }
 0x504   :  { %v1396_v8 = vpop.f32.mrb[38].mxu1 }
 0x505   :  { %v1120_v9 = vpack.c.bf16 %v1396_v8, %v1395_v6  ;;  %v878_v10 = vpop.f32.mrb[39].mxu1 }
 0x506   :  { %v1115_v11 = vpack.c.bf16 %v878_v10, %v875_v7 }
 0x507   :  { %1144 = vst [vmem:[#allocation2 + $0x18] sm:$0xff] %v1120_v9  }
 0x508   :  { %1143 = vst [vmem:[#allocation2 + $0x10] sm:$0xff] %v1115_v11  }
 0x50a   :  { %v1399_v12 = vpop.f32.mrb[40].mxu1 }
 0x50b   :  { %v891_v13 = vpop.f32.mrb[41].mxu1 }
 0x50c   :  { %v1400_v14 = vpop.f32.mrb[42].mxu1 }
 0x50d   :  { %v1130_v15 = vpack.c.bf16 %v1400_v14, %v1399_v12  ;;  %v894_v16 = vpop.f32.mrb[43].mxu1 }
 0x50e   :  { %v1125_v17 = vpack.c.bf16 %v894_v16, %v891_v13 }
 0x50f   :  { %1146 = vst [vmem:[#allocation2 + $0x28] sm:$0xff] %v1130_v15  }
 0x510   :  { %1145 = vst [vmem:[#allocation2 + $0x20] sm:$0xff] %v1125_v17  }
 0x512   :  { %v1403_v18 = vpop.f32.mrb[44].mxu1 }
 0x513   :  { %v907_v19 = vpop.f32.mrb[45].mxu1 }
 0x514   :  { %v1404_v20 = vpop.f32.mrb[46].mxu1 }
 0x515   :  { %v1140_v21 = vpack.c.bf16 %v1404_v20, %v1403_v18  ;;  %v910_v22 = vpop.f32.mrb[47].mxu1 }
 0x516   :  { %v1135_v23 = vpack.c.bf16 %v910_v22, %v907_v19 }
 0x517   :  { %1148 = vst [vmem:[#allocation2 + $0x38] sm:$0xff] %v1140_v21  }
 0x518   :  { %1147 = vst [vmem:[#allocation2 + $0x30] sm:$0xff] %v1135_v23  }
 0x519   :  { %1475 = shalt.err (!%p1472_p4)
}
 0x51a   :  { %s1476_s14 = scalar_lea.hbm %s1757_s4, 1024 }
 0x51b   :  { %p1477_p5 = scmp.ne.s32.totalorder %s1757_s4, %s1476_s14  ;;  %p1480_p6 = scmp.lt.u32.totalorder %s1476_s14, %s1757_s4 }
 0x51d   :  { %p1482_p7 = pnand %p1480_p6, %p1477_p5 }
 0x51f   :  { %1485 = shalt.err (!%p1482_p7)
}
 0x520   :  { %s1489_s19 = smov 64   ;;  %s1490_s20 = smov 4  }
 0x521   :  { %1013 = dma.vmem_to_hbm [thread:$0]  %s1008_s10, 1024, %s1757_s4, [#allocation3], %s1489_s19, %s1489_s19, %s1490_s20  }
 0x522   :  { %1486 = dma.done.wait [#allocation3], 1024  }
 0x523   :  { %1487 = vsyncadd [#allocation3], 4294966272 }
 0x524   :  { %1021 = vsyncpa [#allocation3], 1 }

</bundles_post_ra>
